<compile_context>
chip_gen: v5e
topology: v5e:2x2
jax: 0.10.0
libtpu: 0.0.40
codegen_flags: <defaults>
</compile_context>

<pallas_src>
import jax
import jax.numpy as jnp
from jax.experimental import pallas as pl
from jax.experimental.pallas import tpu as pltpu


def _scale_kernel(coeff_ref, y_ref, o_ref):
    # coeff_ref: (1, 1) f32 scalar in SMEM; y_ref/o_ref: (tile_rows, W) VMEM
    # tiles in y's native dtype. The multiply promotes to f32 on the VPU
    # (free — this kernel is HBM-bound), result is stored in native dtype.
    o_ref[...] = (coeff_ref[0, 0] * y_ref[...]).astype(o_ref.dtype)


def _chip_hints():
    """Best-effort per-generation tile/VMEM tuning; safe defaults otherwise."""
    target_bytes = 4 * 1024 * 1024          # ~4 MiB blocks (plateau of HBM roofline)
    vmem_limit = 32 * 1024 * 1024           # clears v5e's 16 MiB default scoped VMEM
    try:
        kind = jax.devices()[0].device_kind.lower()
    except Exception:
        kind = ""
    if "7" in kind:                         # v7x: ~3.2 TB/s HBM -> amortize per-step cost
        target_bytes = 8 * 1024 * 1024      # 8 MiB x 2 bufs x (in+out) = 32 MiB
        vmem_limit = 48 * 1024 * 1024       # < 64 MiB physical VMEM on v7x
    return target_bytes, vmem_limit


def _scale_2d(y2d, coeff2d, tile_rows, vmem_limit, n_total):
    rows, W = y2d.shape
    grid = (pl.cdiv(rows, tile_rows),)
    return pl.pallas_call(
        _scale_kernel,
        out_shape=jax.ShapeDtypeStruct((rows, W), y2d.dtype),
        grid=grid,
        in_specs=[
            pl.BlockSpec(memory_space=pltpu.SMEM),           # coeff scalar
            pl.BlockSpec((tile_rows, W), lambda i: (i, 0)),  # y tile
        ],
        out_specs=pl.BlockSpec((tile_rows, W), lambda i: (i, 0)),
        compiler_params=pltpu.CompilerParams(
            dimension_semantics=("parallel",),
            vmem_limit_bytes=int(vmem_limit)),
        cost_estimate=pl.CostEstimate(
            flops=n_total, transcendentals=0,
            bytes_accessed=2 * y2d.dtype.itemsize * n_total),
    )(coeff2d, y2d)


def foptim_forward(t, y, coeff):
    """Pallas equivalent of FOptim.forward(t, y): returns coeff * y.

    `t` is unused (matches the reference). `coeff` is a scalar parameter.
    The multiply runs in y's native floating dtype (bandwidth-optimal);
    integer inputs are promoted to float32 like torch would.
    """
    del t  # unused, matches reference semantics

    y = jnp.asarray(y)
    if not jnp.issubdtype(y.dtype, jnp.floating):
        y = y.astype(jnp.float32)
    orig_shape = y.shape
    n = y.size
    itemsize = y.dtype.itemsize

    coeff_f32 = jnp.asarray(coeff, dtype=jnp.float32)

    # ---- Degenerate sizes: no kernel launch needed. ----
    if n == 0:
        return (coeff_f32.astype(y.dtype) * y).reshape(orig_shape)

    y_flat = y.reshape(-1)
    n_aligned = (n // 128) * 128
    if n_aligned == 0:
        # Fewer than 128 elements: plain XLA multiply is cheaper than a launch.
        return (coeff_f32 * y_flat).astype(y.dtype).reshape(orig_shape)
    tail = n - n_aligned  # < 128 elements, handled outside the kernel

    coeff2d = coeff_f32.reshape(1, 1)
    sublane = {1: 32, 2: 16, 4: 8}.get(itemsize, 8)   # packed-sublane tile per dtype
    target_bytes, vmem_limit = _chip_hints()

    # ---- Lane-dense 2D view (copy-free reshape on the common path). ----
    W = 128
    for cand in (8192, 4096, 2048, 1024, 512, 256, 128):
        if n_aligned % cand == 0:
            W = cand
            break
    rows = n_aligned // W
    y2d = (y_flat[:n_aligned] if tail else y_flat).reshape(rows, W)

    # ---- Tile rows so each block is ~target_bytes of HBM traffic. ----
    row_bytes = W * itemsize
    tile_rows = max(sublane, ((target_bytes // row_bytes) // sublane) * sublane)
    aligned_bytes = n_aligned * itemsize
    if aligned_bytes > 4 * 1024 * 1024:
        # Keep >= 4 grid steps: DMA/compute overlap + both TCs on v7x.
        cap = max(sublane, (pl.cdiv(rows, 4) // sublane) * sublane)
        tile_rows = min(tile_rows, cap)
    if tile_rows >= rows:
        tile_rows = rows  # single full-array block (block_shape == array dims)

    out2d = _scale_2d(y2d, coeff2d, tile_rows, vmem_limit, n_aligned)
    out_flat = out2d.reshape(-1)

    if tail:
        # <128-element tail: plain XLA multiply (avoids full-array pad+slice copies).
        tail_out = (coeff_f32 * y_flat[n_aligned:]).astype(y.dtype)
        out_flat = jnp.concatenate([out_flat, tail_out])

    return out_flat.reshape(orig_shape)
    # TODO(synk): the PyTorch `numpy=True` branch is host-side conversion
    # (detach().numpy()); callers can use jax.device_get on the result.


if __name__ == "__main__":
    key = jax.random.PRNGKey(0)
    # Deterministic parameter init, matching FOptim.__init__: coeff = -1.0
    coeff = jnp.float32(-1.0)
    t = jnp.float32(0.0)  # unused by forward, kept for signature parity

    # Small NCHW-like ODE-state tensor (n divisible by 128 -> pure kernel path).
    y = jax.random.normal(key, (2, 4, 16, 16), dtype=jnp.float32)
    out = foptim_forward(t, y, coeff)
    out = jax.block_until_ready(out)
    ref = coeff * y
    assert out.shape == y.shape and out.dtype == y.dtype
    assert jnp.allclose(out, ref, atol=1e-6, rtol=1e-6)

    # Awkward size (n % 128 != 0) -> aligned-prefix kernel + XLA tail path.
    y_odd = jax.random.normal(jax.random.PRNGKey(1), (7, 100), dtype=jnp.float32)
    out_odd = jax.block_until_ready(foptim_forward(t, y_odd, coeff))
    assert out_odd.shape == y_odd.shape and out_odd.dtype == y_odd.dtype
    assert jnp.allclose(out_odd, coeff * y_odd, atol=1e-6, rtol=1e-6)

    print("KERNEL_OK")
</pallas_src>

<mosaic_0001>
module attributes {stable_mosaic.version = 11 : i64} {
  func.func @_scale_kernel(%arg0: i32, %arg1: memref<1x1xf32, #tpu.memory_space<smem>>, %arg2: memref<1x2048xf32, #tpu.memory_space<vmem>>, %arg3: memref<1x2048xf32, #tpu.memory_space<vmem>>) attributes {dimension_semantics = [#tpu.dimension_semantics<parallel>], iteration_bounds = array<i64: 1>, scalar_prefetch = 0 : i64, scratch_operands = 0 : i64, tpu.core_type = #tpu.core_type<tc>, window_params = [{transform_indices = @transform_0, window_bounds = array<i64: 1, 1>}, {transform_indices = @transform_1, window_bounds = array<i64: 1, 2048>}, {transform_indices = @transform_2, window_bounds = array<i64: 1, 2048>}]} {
    %c0 = arith.constant 0 : index
    %c0_0 = arith.constant 0 : index
    %0 = memref.load %arg1[%c0, %c0_0] : memref<1x1xf32, #tpu.memory_space<smem>>
    %c0_1 = arith.constant 0 : index
    %c0_2 = arith.constant 0 : index
    %1 = vector.load %arg2[%c0_1, %c0_2] : memref<1x2048xf32, #tpu.memory_space<vmem>>, vector<1x2048xf32>
    %2 = vector.broadcast %0 : f32 to vector<1x2048xf32>
    %3 = arith.mulf %2, %1 : vector<1x2048xf32>
    %c0_3 = arith.constant 0 : index
    %c0_4 = arith.constant 0 : index
    %4 = vector.load %arg3[%c0_3, %c0_4] : memref<1x2048xf32, #tpu.memory_space<vmem>>, vector<1x2048xf32>
    tpu.vector_store %arg3[%c0_3, %c0_4], %3 {strides = array<i32>} : memref<1x2048xf32, #tpu.memory_space<vmem>>, vector<1x2048xf32>,
    return
  }
  func.func @transform_0(%arg0: i32) -> (i32, i32) {
    %c0_i32 = arith.constant 0 : i32
    %c0_i32_0 = arith.constant 0 : i32
    %c0_i32_1 = arith.constant 0 : i32
    return %c0_i32, %c0_i32_0 : i32, i32
  }
  func.func @transform_1(%arg0: i32) -> (i32, i32) {
    %c0_i32 = arith.constant 0 : i32
    %c0_i32_0 = arith.constant 0 : i32
    return %arg0, %c0_i32 : i32, i32
  }
  func.func @transform_2(%arg0: i32) -> (i32, i32) {
    %c0_i32 = arith.constant 0 : i32
    %c0_i32_0 = arith.constant 0 : i32
    return %arg0, %c0_i32 : i32, i32
  }
}

</mosaic_0001>

<bundles_post_ra>
// kernel: tpu_custom_call.1
= control target key start
LH: loop header
LB: loop body
LE: loop exit
PB: predicated region body
PF: predicated region fallthrough
CT: control target
= control target key end

     0   :  { %8 = vsyncpa [#allocation4], 0  ;;  %s132_s0 = inlined_call_operand.<no memory space> [shape: f32[1,1], index: 0, kind: input, shape index: {}]   ;;  %s133_s1 = inlined_call_operand.hbm [shape: f32[1,2048], index: 1, kind: input, shape index: {}]   ;;  %s134_s2 = inlined_call_operand.hbm [shape: f32[1,2048], index: 2, kind: output, shape index: {}]  }
   0x1   :  { %9 = vsyncpa [#allocation5], 0  ;;  %s17_s11 = sshll.u32 %s133_s1, 4  ;;  %s106_s12 = smov [#allocation3]   ;;  %s18_s11 = int_to_ptr.hbm [resolvable:$true] %s17_s11 }
   0x2   :  { %s19_s13 = sshll.u32 %s106_s12, 4  ;;  %s20_s13 = int_to_ptr.vmem [resolvable:$true] %s19_s13 }
   0x3   :  { %22 = dma.hbm_to_vmem [thread:$0]  %s18_s11, 256, %s20_s13, [#allocation4]  }
   0x4   :  { %102 = dma.done.wait [#allocation4], 256  }
   0x5   :  { %103 = vsyncadd [#allocation4], 4294967040  ;;  %v30_v0 = vstv %s132_s0  ;;  %s107_s16 = smov [#allocation6]   ;;  %s42_s20 = sshll.u32 %s134_s2, 4  ;;  %v28_v1 = vld [vmem:[#allocation3] sm:$0xff]  ;;  %v29_v2 = vld [vmem:[#allocation3 + $0x8] sm:$0xff]  ;;  %s43_s20 = int_to_ptr.hbm [resolvable:$true] %s42_s20 }
   0x6   :  { %s40_s17 = sshll.u32 %s107_s16, 4  ;;  %v31_v3 = vmul.f32 %v30_v0, %v28_v1  ;;  %v32_v4 = vmul.f32 %v30_v0, %v29_v2  ;;  %s41_s17 = int_to_ptr.vmem [resolvable:$true] %s40_s17 }
   0x8   :  { %33 = vst [vmem:[#allocation6] sm:$0xff] %v31_v3 }
   0x9   :  { %34 = vst [vmem:[#allocation6 + $0x8] sm:$0xff] %v32_v4 }
   0xa   :  { %45 = dma.vmem_to_hbm [thread:$0]  %s41_s17, 256, %s43_s20, [#allocation5]  }
   0xb   :  { %104 = dma.done.wait [#allocation5], 256  }
   0xc   :  { %105 = vsyncadd [#allocation5], 4294967040 }
   0xd   :  { %50 = vsyncpa [#allocation4], 1 }
   0xe   :  { %51 = vsyncpa [#allocation5], 1 }

</bundles_post_ra>
